<compile_context>
chip_gen: v5e
topology: v5e:2x2
jax: 0.10.0
libtpu: 0.0.40
codegen_flags: <defaults>
</compile_context>

<pallas_src>
import functools
import math

import jax
import jax.numpy as jnp
from jax import lax
from jax.experimental import pallas as pl
from jax.experimental.pallas import tpu as pltpu


def _round_up(x: int, m: int) -> int:
    return ((x + m - 1) // m) * m


def _choose_fold(n_rbf: int, max_lanes: int = 4096) -> int:
    """Smallest fold with (fold * n_rbf) % 128 == 0 -> unmasked lane-dense stores."""
    if n_rbf % 128 == 0:
        return 1
    fold = math.lcm(n_rbf, 128) // n_rbf
    return fold if fold * n_rbf <= max_lanes else 1  # fallback: masked stores


def rbf_kernel(lhs_ref, sel_ref, o_ref, *, prefactor):
    # lhs_ref: (rows, K)      rows of [d_0 .. d_{fold-1}, 1, 0-pad]
    # sel_ref: (K, lanes)     affine selector (resident): row i -> 1/s on lanes
    #                         [i*N,(i+1)*N); row 'fold' -> -tile(centers)/s
    # o_ref:   (rows, lanes)  lane-dense output tile
    #
    # One MXU matmul produces x = (d - c)/s for every (pair, rbf) lane; the VPU only
    # squares it.  HIGHEST precision keeps the affine result f32-accurate.
    x = jnp.dot(lhs_ref[...], sel_ref[...],
                preferred_element_type=jnp.float32,
                precision=lax.Precision.HIGHEST)
    if prefactor == 1.0:
        y = jnp.exp(-(x * x))
    elif prefactor > 0.0:
        # fold prefactor into the exponent: p * exp(-x^2) = exp(log p - x^2)
        y = jnp.exp(math.log(prefactor) - x * x)
    else:
        y = prefactor * jnp.exp(-(x * x))
    o_ref[...] = y.astype(o_ref.dtype)


def radial_basis_function(distances, centers, scale_factor, prefactor=1.0, *,
                          tile_pairs=32768, out_dtype=None,
                          vmem_buffer_budget=16 << 20):
    """Gaussian RBF features:  [P,1] distances, [N] centers ->
       [P,N] = prefactor * exp(-((d - c)/s)^2).  Handles ragged P by padding."""
    P = int(distances.shape[0])
    N = int(centers.shape[0])
    out_dtype = jnp.dtype(distances.dtype if out_dtype is None else out_dtype)
    out_itemsize = out_dtype.itemsize
    f32 = jnp.float32

    # ---- lane-dense packing geometry -------------------------------------------------
    fold = _choose_fold(N)
    lanes = fold * N
    K = _round_up(fold + 1, 8)              # d columns + ones column, padded to 8

    sublane_q = max(8, 32 // out_itemsize)  # 8 rows for f32, 16 for bf16 output
    pair_q = sublane_q * fold               # pairs per legal output-block row quantum

    # ---- tile sizing against a VMEM buffer budget (double-buffered in/out) ----------
    # lhs block is lane-padded to >=128 f32 lanes in VMEM; output block is lanes wide.
    row_bytes = max(K, 128) * 4 + lanes * out_itemsize
    max_rows = (vmem_buffer_budget // (2 * row_bytes)) // sublane_q * sublane_q
    max_rows = max(sublane_q, max_rows)

    tile_pairs = min(int(tile_pairs), max_rows * fold)
    tile_pairs = max(pair_q, (tile_pairs // pair_q) * pair_q)

    P_min = _round_up(max(P, 1), pair_q)
    tile_pairs = min(tile_pairs, P_min)     # don't over-pad small inputs
    if tile_pairs == P_min and P_min >= 2 * pair_q:
        # keep >= 2 grid steps so both v7x TensorCores get work
        tile_pairs = _round_up(-(-P_min // 2), pair_q)
    P_pad = _round_up(P_min, tile_pairs)
    tile_rows = tile_pairs // fold
    R = P_pad // fold
    grid = (P_pad // tile_pairs,)

    # ---- host-side operand preparation (cheap: ~1/16 of output traffic) --------------
    d = distances.reshape(P, 1).astype(f32)
    if P_pad != P:
        d = jnp.pad(d, ((0, P_pad - P), (0, 0)))
    d_cols = d.reshape(R, fold)                                  # layout-identical
    lhs = jnp.concatenate([d_cols, jnp.ones((R, 1), f32)], axis=1)
    if K > fold + 1:
        lhs = jnp.pad(lhs, ((0, 0), (0, K - (fold + 1))))        # (R, K)

    inv_s = 1.0 / float(scale_factor)
    expand = jnp.repeat(jnp.eye(fold, dtype=f32), N, axis=1)     # (fold, lanes) one-hot
    c_row = -jnp.tile(centers.astype(f32).reshape(1, N), (1, fold))
    sel = jnp.concatenate([expand, c_row], axis=0) * inv_s       # (fold+1, lanes)
    if K > fold + 1:
        sel = jnp.pad(sel, ((0, K - (fold + 1)), (0, 0)))        # (K, lanes)

    cost = pl.CostEstimate(
        flops=2 * R * K * lanes + 3 * R * lanes,
        transcendentals=R * lanes,
        bytes_accessed=R * K * 4 + K * lanes * 4 + R * lanes * out_itemsize,
    )

    kernel = functools.partial(rbf_kernel, prefactor=float(prefactor))

    out = pl.pallas_call(
        kernel,
        out_shape=jax.ShapeDtypeStruct((R, lanes), out_dtype),
        grid_spec=pltpu.PrefetchScalarGridSpec(
            num_scalar_prefetch=0,
            grid=grid,
            in_specs=[
                pl.BlockSpec((tile_rows, K), lambda i: (i, 0)),   # packed distances
                pl.BlockSpec((K, lanes), lambda i: (0, 0)),       # affine selector (resident)
            ],
            out_specs=pl.BlockSpec((tile_rows, lanes), lambda i: (i, 0)),
        ),
        compiler_params=pltpu.CompilerParams(
            dimension_semantics=("parallel",),
            vmem_limit_bytes=32 << 20,   # buffers budgeted to <=16 MiB -> safe on v5e/v6e/v7x
        ),
        cost_estimate=cost,
    )(lhs, sel)

    out = out.reshape(P_pad, N)
    if P_pad != P:
        out = out[:P]
    return out


if __name__ == "__main__":
    # Deterministic synthetic setup (not a checkpoint load).
    num_pairs = 1000      # ragged on purpose: exercises pad/unpad path
    num_rbf = 32
    cutoff_nm = 0.5

    # Centers evenly spaced in [0, cutoff]; scale = spacing (standard Gaussian RBF).
    centers = jnp.linspace(0.0, cutoff_nm, num_rbf, dtype=jnp.float32)
    scale_factor = float(centers[1] - centers[0])
    prefactor = 1.0       # non-trainable buffer in the reference module

    key = jax.random.PRNGKey(0)
    distances = jax.random.uniform(
        key, (num_pairs, 1), dtype=jnp.float32, minval=0.0, maxval=cutoff_nm
    )

    # Pure-JAX reference of the same forward semantics.
    x_ref = (distances - centers.reshape(1, -1)) / scale_factor
    ref = prefactor * jnp.exp(-(x_ref ** 2))

    # Small tile -> multi-step grid (exercises padding + pipelining).
    out_small = jax.block_until_ready(
        radial_basis_function(distances, centers, scale_factor, prefactor,
                              tile_pairs=256))
    assert out_small.shape == (num_pairs, num_rbf)
    assert jnp.allclose(out_small, ref, atol=1e-5, rtol=1e-5)

    # Default (large) tile -> clamps to the padded problem, keeps >=2 grid steps.
    out_big = jax.block_until_ready(
        radial_basis_function(distances, centers, scale_factor, prefactor))
    assert jnp.allclose(out_big, ref, atol=1e-5, rtol=1e-5)

    # Optional bf16 output (halves the dominant HBM write traffic for tolerant consumers).
    out_bf16 = jax.block_until_ready(
        radial_basis_function(distances, centers, scale_factor, prefactor,
                              out_dtype=jnp.bfloat16))
    assert jnp.allclose(out_bf16.astype(jnp.float32), ref, atol=2e-2, rtol=2e-2)

    print("KERNEL_OK")
</pallas_src>

<mosaic_0001>
module attributes {stable_mosaic.version = 11 : i64} {
  func.func @rbf_kernel(%arg0: i32, %arg1: memref<64x8xf32, #tpu.memory_space<vmem>>, %arg2: memref<8x128xf32, #tpu.memory_space<vmem>>, %arg3: memref<64x128xf32, #tpu.memory_space<vmem>>) attributes {dimension_semantics = [#tpu.dimension_semantics<parallel>], iteration_bounds = array<i64: 4>, scalar_prefetch = 0 : i64, scratch_operands = 0 : i64, tpu.core_type = #tpu.core_type<tc>, window_params = [{transform_indices = @transform_0, window_bounds = array<i64: 64, 8>}, {pipeline_mode = #tpu.pipeline_mode<synchronous>, transform_indices = @transform_1, window_bounds = array<i64: 8, 128>}, {transform_indices = @transform_2, window_bounds = array<i64: 64, 128>}]} {
    %c0 = arith.constant 0 : index
    %c0_0 = arith.constant 0 : index
    %0 = vector.load %arg1[%c0, %c0_0] : memref<64x8xf32, #tpu.memory_space<vmem>>, vector<64x8xf32>
    %c0_1 = arith.constant 0 : index
    %c0_2 = arith.constant 0 : index
    %1 = vector.load %arg2[%c0_1, %c0_2] : memref<8x128xf32, #tpu.memory_space<vmem>>, vector<8x128xf32>
    %cst = arith.constant dense<0.000000e+00> : vector<64x128xf32>
    %2 = tpu.matmul %0, %1, %cst {dimension_numbers = #tpu.dot_dimension_numbers<[1], [0], [0], [1], [0, 0, 1, 1], [], []>, precision = #tpu.contract_precision<fp32>} : vector<64x8xf32>, vector<8x128xf32>, vector<64x128xf32> -> vector<64x128xf32>
    %3 = arith.mulf %2, %2 : vector<64x128xf32>
    %cst_3 = arith.constant 0.000000e+00 : f32
    %4 = vector.broadcast %cst_3 : f32 to vector<64x128xf32>
    %5 = arith.subf %4, %3 : vector<64x128xf32>
    %6 = math.exp %5 : vector<64x128xf32>
    %c0_4 = arith.constant 0 : index
    %c0_5 = arith.constant 0 : index
    %7 = vector.load %arg3[%c0_4, %c0_5] : memref<64x128xf32, #tpu.memory_space<vmem>>, vector<64x128xf32>
    tpu.vector_store %arg3[%c0_4, %c0_5], %6 {strides = array<i32>} : memref<64x128xf32, #tpu.memory_space<vmem>>, vector<64x128xf32>,
    return
  }
  func.func @transform_0(%arg0: i32) -> (i32, i32) {
    %c0_i32 = arith.constant 0 : i32
    %c0_i32_0 = arith.constant 0 : i32
    return %arg0, %c0_i32 : i32, i32
  }
  func.func @transform_1(%arg0: i32) -> (i32, i32) {
    %c0_i32 = arith.constant 0 : i32
    %c0_i32_0 = arith.constant 0 : i32
    %c0_i32_1 = arith.constant 0 : i32
    return %c0_i32, %c0_i32_0 : i32, i32
  }
  func.func @transform_2(%arg0: i32) -> (i32, i32) {
    %c0_i32 = arith.constant 0 : i32
    %c0_i32_0 = arith.constant 0 : i32
    return %arg0, %c0_i32 : i32, i32
  }
}

</mosaic_0001>

<bundles_post_ra>
// kernel: tpu_custom_call.1
= control target key start
LH: loop header
LB: loop body
LE: loop exit
PB: predicated region body
PF: predicated region fallthrough
CT: control target
= control target key end

     0   :  { %7 = vsyncpa [#allocation3], 0  ;;  %s1004_s0 = inlined_call_operand.vmem [shape: f32[256,8], index: 0, kind: input, shape index: {}]   ;;  %s1005_s1 = inlined_call_operand.vmem [shape: f32[8,128], index: 1, kind: input, shape index: {}]   ;;  %s1006_s2 = inlined_call_operand.hbm [shape: f32[256,128], index: 2, kind: output, shape index: {}]  }
   0x1   :  { %9 = vsyncpa [#allocation3 + $0x1], 0  ;;  %s813_s9 = smov 0   ;;  %s815_s10 = smov 0  }
   0x2   :  { %s817_s11 = smov 0   ;;  %s819_s12 = smov 0  }
   0x3 LB: > { %s834_s13 = sadd.s32 4294967295, %s794_s12   ;;  %s660_s14 = sadd.s32 4294967294, %s794_s12   ;;  %s794_s12 = sphi %s819_s12, %s1012_s12   ;;  %s790_s11 = sphi %s817_s11, %s1011_s11   ;;  %s786_s10 = sphi %s815_s10, %s1010_s10   ;;  %s782_s9 = sphi %s813_s9, %s1009_s9  }
   0x4   : > { %s838_s15 = sadd.s32 1, %s794_s12   ;;  %s69_s16 = sadd.s32 1, %s790_s11 }
   0x5   : > { %s66_s17 = ssub.s32 %s794_s12, %s838_s15  ;;  %p79_p0 = scmp.ne.s32.totalorder %s790_s11, %s786_s10 }
   0x6   : > { %p67_p1 = scmp.eq.s32.totalorder %s66_s17, 0  ;;  %p80_p2 = scmp.eq.s32.totalorder %s834_s13, 3 }
   0x7   : > { %p85_p3 = scmp.ne.s32.totalorder %s786_s10, %s782_s9  ;;  %p86_p4 = scmp.eq.s32.totalorder %s660_s14, 3 }
   0x8   : > { %s849_s18 = scalar_select %p67_p1, %s790_s11, %s69_s16  }
   0x9   : > { %p851_p5 = por %p80_p2, %p79_p0  ;;  %p855_p6 = por %p86_p4, %p85_p3 }
   0xa   : > { %p663_p7 = scmp.ge.s32.totalorder %s794_s12, 1  ;;  %p116_p8 = scmp.lt.s32.totalorder %s794_s12, 5 }
   0xc   : > { %p117_p9 = pnand %p663_p7, %p116_p8 }
   0xd   : > { %s665_s23 = sshll.u32 (!%p117_p9), %s834_s13, 3  ;;  %s135_s28 = sand.u32 (!%p117_p9), 1, %s786_s10  }
   0xe   : > { %120 = sbr.rel (%p117_p9) target bundleno = 279 (0x117), region = 28  ;;  %p139_p10 = scmp.lt.s32.totalorder (!%p117_p9), %s665_s23, 31 }
   0xf   : > { %s664_s29 = sshll.u32 (!%p117_p9), %s135_s28, 6  ;;  %s672_s3 = sshll.u32 (!%p117_p9), %s834_s13, 6 }
  0x10   : > { %s952_s30 = scalar_lea.vmem (!%p117_p9), [#allocation2], %s664_s29  ;;  %s594_s6 = scalar_lea.hbm (!%p117_p9), %s1006_s2, %s672_s3 }
  0x11   : > { %s595_s7 = sshll.u32 (!%p117_p9), %s952_s30, 4  ;;  %s597_s8 = sshll.u32 (!%p117_p9), %s594_s6, 4  ;;  %s596_s7 = int_to_ptr.vmem [resolvable:$true] %s595_s7  ;;  %s598_s8 = int_to_ptr.hbm [resolvable:$true] %s597_s8 }
  0x12   : > { %s583_s14 = scalar_lea.sflag (!%p117_p9), [#allocation3], %s135_s28  ;;  %s746_s16 = sshra.s32 (!%p117_p9), %s598_s8, 4  ;;  %s747_s16 = int_to_ptr.hbm [resolvable:$true] %s746_s16 }
  0x13   : > { %v153_v0 = vld [vmem:[%s1005_s1] sm:$0xff]  ;;  %s1014_s23 = smov (!%p139_p10, %s665_s23), 31  ;;  %vm154_vm0 = vcmask 64512   ;;  %s748_s13 = scalar_lea.hbm %s747_s16, 64 }
  0x14   : > { %v194_v1 = vand.u32 4294901760, %v153_v0  ;;  %s666_s24 = sshll.u32 %s1014_s23, 3  ;;  %p749_p11 = scmp.ne.s32.totalorder %s747_s16, %s748_s13 }
  0x15   : > { %s868_s27 = scalar_lea.vmem %s1004_s0, %s666_s24  ;;  %s752_s22 = scalar_lea.hbm %s1006_s2, 256 }
  0x16   : > { %673 = vmatpush.msra.mxu2 %v194_v1  ;;  %v277_v2 = vsub.f32 %v153_v0, %v194_v1  ;;  %195 = vmatpush.msra.mxu0 %v194_v1  ;;  %v149_v5 = vld [vmem:[%s868_s27 + $0x20] sm:$0xff]  ;;  %v150_v6 = vld [vmem:[%s868_s27 + $0x28] sm:$0xff]  ;;  %v151_v11 = vld [vmem:[%s868_s27 + $0x30] sm:$0xff]  ;;  %p750_p12 = pnand %p749_p11, %p851_p5  ;;  %p753_p0 = scmp.lt.s32.totalorder %s747_s16, %s1006_s2 }
  0x17   : > { %v145_v7 = vld [vmem:[%s868_s27] sm:$0xff]  ;;  %v168_v8 = vsel %vm154_vm0, %v149_v5, 0  ;;  %v171_v9 = vsel %vm154_vm0, %v150_v6, 0  ;;  %v146_v12 = vld [vmem:[%s868_s27 + $0x8] sm:$0xff]  ;;  %v147_v17 = vld [vmem:[%s868_s27 + $0x10] sm:$0xff]  ;;  %v174_v22 = vsel %vm154_vm0, %v151_v11, 0  ;;  %p754_p1 = scmp.lt.s32.totalorder %s752_s22, %s748_s13 }
  0x18   : > { %v278_v3 = vand.u32 4294901760, %v277_v2  ;;  %332 = vmatpush.msrb.mxu2 %v277_v2  ;;  %v156_v10 = vsel %vm154_vm0, %v145_v7, 0  ;;  %v878_v14 = vand.u32 4294901760, %v168_v8  ;;  %v880_v15 = vand.u32 4294901760, %v171_v9  ;;  %v152_v32 = vld [vmem:[%s868_s27 + $0x38] sm:$0xff]  ;;  %p751_p13 = pneg %p750_p12 }
  0x19   : > { %v882_v16 = vand.u32 4294901760, %v156_v10  ;;  %v159_v18 = vsel %vm154_vm0, %v146_v12, 0  ;;  %v162_v24 = vsel %vm154_vm0, %v147_v17, 0  ;;  %v898_v27 = vand.u32 4294901760, %v174_v22  ;;  %v148_v35 = vld [vmem:[%s868_s27 + $0x18] sm:$0xff]  ;;  %p755_p2 = por %p754_p1, %p753_p0 }
  0x1a   : > { %v279_v4 = vsub.f32 %v277_v2, %v278_v3  ;;  %458 = vmatpush.msrb.mxu0 %v278_v3  ;;  %v887_v19 = vsub.f32 %v168_v8, %v878_v14  ;;  %v890_v20 = vsub.f32 %v171_v9, %v880_v15  ;;  %v204_v23 = vand.u32 4294901760, %v159_v18 }
  0x1b   : > { %v197_v21 = vsub.f32 %v156_v10, %v882_v16  ;;  %v212_v33 = vand.u32 4294901760, %v162_v24  ;;  %v907_v38 = vsub.f32 %v174_v22, %v898_v27  ;;  %v177_v39 = vsel %vm154_vm0, %v152_v32, 0  ;;  %p756_p3 = pnand %p755_p2, %p751_p13 }
  0x1c   : > { %v280_v13 = vand.u32 4294901760, %v279_v4  ;;  %v230_v25 = vand.u32 4294901760, %v887_v19  ;;  %v205_v28 = vsub.f32 %v159_v18, %v204_v23  ;;  %v238_v30 = vand.u32 4294901760, %v890_v20 }
  0x1d   : > { %v198_v26 = vand.u32 4294901760, %v197_v21  ;;  %v213_v42 = vsub.f32 %v162_v24, %v212_v33  ;;  %v165_v43 = vsel %vm154_vm0, %v148_v35, 0  ;;  %v252_v44 = vand.u32 4294901760, %v177_v39 }
  0x1e   : > { %674 = vmatpush.msra.mxu3 %v280_v13  ;;  %281 = vmatpush.msra.mxu1 %v280_v13  ;;  %v231_v29 = vsub.f32 %v887_v19, %v230_v25  ;;  %v206_v34 = vand.u32 4294901760, %v205_v28  ;;  %v239_v40 = vsub.f32 %v890_v20, %v238_v30  ;;  %v220_v45 = vand.u32 4294901760, %v165_v43 }
  0x1f   : > { %299 = vmatmul.f32.vlgmr.msra.gmra.mxu3 %v878_v14  ;;  %283 = vmatmul.f32.vlgmr.msra.gmra.mxu1 %v882_v16  ;;  %v199_v31 = vsub.f32 %v197_v21, %v198_v26  ;;  %v246_v47 = vand.u32 4294901760, %v907_v38  ;;  %v214_v49 = vand.u32 4294901760, %v213_v42  ;;  %v253_v50 = vsub.f32 %v177_v39, %v252_v44 }
  0x20   : > { %390 = vmatpush.msrb.mxu3 %v194_v1  ;;  %508 = vmatpush.msrb.mxu1 %v194_v1  ;;  %v232_v36 = vand.u32 4294901760, %v231_v29  ;;  %v207_v41 = vsub.f32 %v205_v28, %v206_v34  ;;  %v240_v46 = vand.u32 4294901760, %v239_v40  ;;  %v221_v53 = vsub.f32 %v165_v43, %v220_v45 }
  0x21   : > { %v200_v37 = vand.u32 4294901760, %v199_v31  ;;  %v247_v51 = vsub.f32 %v907_v38, %v246_v47  ;;  %v215_v52 = vsub.f32 %v213_v42, %v214_v49  ;;  %v254_v55 = vand.u32 4294901760, %v253_v50 }
  0x22   : > { %233 = vmatmul.f32.vlgmr.msra.gmra.mxu2 %v232_v36  ;;  %v208_v48 = vand.u32 4294901760, %v207_v41  ;;  %v222_v57 = vand.u32 4294901760, %v221_v53 }
  0x23   : > { %201 = vmatmul.f32.vlgmr.msra.gmra.mxu0 %v200_v37  ;;  %v248_v54 = vand.u32 4294901760, %v247_v51  ;;  %v216_v56 = vand.u32 4294901760, %v215_v52  ;;  %v255_v58 = vsub.f32 %v253_v50, %v254_v55 }
  0x24   : > { %v223_v59 = vsub.f32 %v221_v53, %v222_v57 }
  0x25   : > { %v256_v60 = vand.u32 4294901760, %v255_v58 }
  0x26   : > { %v224_v61 = vand.u32 4294901760, %v223_v59 }
  0x27   : > { %303 = vmatmul.f32.gmra.mxu3 %v880_v15  ;;  %287 = vmatmul.f32.gmra.mxu1 %v204_v23 }
  0x2a   : > { %241 = vmatmul.f32.gmra.mxu2 %v240_v46 }
  0x2b   : > { %209 = vmatmul.f32.gmra.mxu0 %v208_v48 }
  0x2f   : > { %307 = vmatmul.f32.gmra.mxu3 %v898_v27  ;;  %291 = vmatmul.f32.gmra.mxu1 %v212_v33 }
  0x32   : > { %249 = vmatmul.f32.gmra.mxu2 %v248_v54 }
  0x33   : > { %217 = vmatmul.f32.gmra.mxu0 %v216_v56 }
  0x37   : > { %311 = vmatmul.f32.gmra.mxu3 %v252_v44  ;;  %295 = vmatmul.f32.gmra.mxu1 %v220_v45 }
  0x3a   : > { %257 = vmatmul.f32.gmra.mxu2 %v256_v60 }
  0x3b   : > { %225 = vmatmul.f32.gmra.mxu0 %v224_v61 }
  0x3f   : > { %394 = vmatmul.f32.vlgmr.msrb.gmra.mxu3 %v198_v26  ;;  %510 = vmatmul.f32.vlgmr.msrb.gmra.mxu1 %v882_v16 }
  0x42   : > { %335 = vmatmul.f32.vlgmr.msrb.gmra.mxu2 %v197_v21 }
  0x43   : > { %460 = vmatmul.f32.vlgmr.msrb.gmra.mxu0 %v882_v16 }
  0x47   : > { %400 = vmatmul.f32.gmra.mxu3 %v206_v34  ;;  %514 = vmatmul.f32.gmra.mxu1 %v204_v23 }
  0x4a   : > { %340 = vmatmul.f32.gmra.mxu2 %v205_v28 }
  0x4b   : > { %464 = vmatmul.f32.gmra.mxu0 %v204_v23 }
  0x4f   : > { %406 = vmatmul.f32.gmra.mxu3 %v214_v49  ;;  %518 = vmatmul.f32.gmra.mxu1 %v212_v33 }
  0x52   : > { %345 = vmatmul.f32.gmra.mxu2 %v213_v42 }
  0x53   : > { %468 = vmatmul.f32.gmra.mxu0 %v212_v33 }
  0x57   : > { %412 = vmatmul.f32.gmra.mxu3 %v222_v57  ;;  %522 = vmatmul.f32.gmra.mxu1 %v220_v45 }
  0x5a   : > { %350 = vmatmul.f32.gmra.mxu2 %v221_v53 }
  0x5b   : > { %472 = vmatmul.f32.gmra.mxu0 %v220_v45 }
  0x5f   : > { %418 = vmatmul.f32.gmra.mxu3 %v230_v25  ;;  %526 = vmatmul.f32.gmra.mxu1 %v878_v14 }
  0x62   : > { %355 = vmatmul.f32.gmra.mxu2 %v887_v19 }
  0x63   : > { %476 = vmatmul.f32.gmra.mxu0 %v878_v14 }
  0x67   : > { %424 = vmatmul.f32.gmra.mxu3 %v238_v30  ;;  %530 = vmatmul.f32.gmra.mxu1 %v880_v15 }
  0x6a   : > { %360 = vmatmul.f32.gmra.mxu2 %v890_v20 }
  0x6b   : > { %480 = vmatmul.f32.gmra.mxu0 %v880_v15 }
  0x6f   : > { %430 = vmatmul.f32.gmra.mxu3 %v246_v47  ;;  %534 = vmatmul.f32.gmra.mxu1 %v898_v27 }
  0x72   : > { %365 = vmatmul.f32.gmra.mxu2 %v907_v38 }
  0x73   : > { %484 = vmatmul.f32.gmra.mxu0 %v898_v27 }
  0x77   : > { %436 = vmatmul.f32.gmra.mxu3 %v254_v55  ;;  %538 = vmatmul.f32.gmra.mxu1 %v252_v44 }
  0x7a   : > { %370 = vmatmul.f32.gmra.mxu2 %v253_v50 }
  0x7b   : > { %488 = vmatmul.f32.gmra.mxu0 %v252_v44 }
  0x9c   : > { %v284_v62 = vpop.f32.mrf.mxu1 }
  0xa0   : > { %v202_v0 = vpop.f32.mrf.mxu0 }
  0xa1   : > { %v285_v17 = vadd.f32 %v284_v62, %v202_v0 }
  0xa2   : > { %v933_v63 = vpop.f32.mrf.mxu3 }
  0xa4   : > { %v288_v1 = vpop.f32.mrf.mxu1 }
  0xa5   : > { %v935_v2 = vpop.f32.mrf.mxu2 }
  0xa6   : > { %v301_v0 = vadd.f32 %v933_v63, %v935_v2 }
  0xa8   : > { %v210_v4 = vpop.f32.mrf.mxu0 }
  0xa9   : > { %v289_v25 = vadd.f32 %v288_v1, %v210_v4 }
  0xaa   : > { %v937_v3 = vpop.f32.mrf.mxu3 }
  0xac   : > { %v292_v5 = vpop.f32.mrf.mxu1 }
  0xad   : > { %v939_v6 = vpop.f32.mrf.mxu2 }
  0xb0   : > { %v218_v8 = vpop.f32.mrf.mxu0 }
  0xb1   : > { %v293_v37 = vadd.f32 %v292_v5, %v218_v8 }
  0xb2   : > { %v941_v7 = vpop.f32.mrf.mxu3 }
  0xb4   : > { %v296_v9 = vpop.f32.mrf.mxu1 }
  0xb5   : > { %v943_v10 = vpop.f32.mrf.mxu2 }
  0xb8   : > { %v226_v12 = vpop.f32.mrf.mxu0 }
  0xb9   : > { %v297_v50 = vadd.f32 %v296_v9, %v226_v12 }
  0xba   : > { %v945_v11 = vpop.f32.mrf.mxu3 }
  0xbc   : > { %v511_v13 = vpop.f32.mrf.mxu1 }
  0xbd   : > { %v947_v14 = vpop.f32.mrf.mxu2 }
  0xc0   : > { %v461_v16 = vpop.f32.mrf.mxu0 }
  0xc2   : > { %v395_v15 = vpop.f32.mrf.mxu3 }
  0xc4   : > { %v515_v19 = vpop.f32.mrf.mxu1 }
  0xc5   : > { %v336_v18 = vpop.f32.mrf.mxu2 }
  0xc6   : > { %v337_v20 = vadd.f32 %v336_v18, %v285_v17 }
  0xc8   : > { %v465_v22 = vpop.f32.mrf.mxu0  ;;  %v396_v23 = vadd.f32 %v395_v15, %v337_v20 }
  0xca   : > { %v401_v21 = vpop.f32.mrf.mxu3  ;;  %v462_v24 = vadd.f32 %v461_v16, %v396_v23 }
  0xcc   : > { %v512_v26 = vadd.f32 %v511_v13, %v462_v24  ;;  %v519_v32 = vpop.f32.mrf.mxu1 }
  0xcd   : > { %v341_v27 = vpop.f32.mrf.mxu2 }
  0xce   : > { %v542_v28 = vmul.f32 %v512_v26, %v512_v26  ;;  %v342_v29 = vadd.f32 %v341_v27, %v289_v25 }
  0xd0   : > { %v469_v31 = vpop.f32.mrf.mxu0  ;;  %v550_v33 = vsub.f32 0.0, %v542_v28  ;;  %v402_v34 = vadd.f32 %v401_v21, %v342_v29  ;;  %v309_v29 = vadd.f32 %v941_v7, %v943_v10 }
  0xd2   : > { %v407_v30 = vpop.f32.mrf.mxu3  ;;  %v558_v35 = vmul.f32 1.442695, %v550_v33  ;;  %v466_v36 = vadd.f32 %v465_v22, %v402_v34 }
  0xd4   : > { %716 = vpow2.f32 %v558_v35  ;;  %v516_v38 = vadd.f32 %v515_v19, %v466_v36  ;;  %v523_v46 = vpop.f32.mrf.mxu1  ;;  %v305_v19 = vadd.f32 %v937_v3, %v939_v6 }
  0xd5   : > { %v346_v39 = vpop.f32.mrf.mxu2 }
  0xd6   : > { %v543_v40 = vmul.f32 %v516_v38, %v516_v38  ;;  %v347_v41 = vadd.f32 %v346_v39, %v293_v37  ;;  %v313_v39 = vadd.f32 %v945_v11, %v947_v14 }
  0xd8   : > { %v473_v43 = vpop.f32.mrf.mxu0  ;;  %v551_v44 = vsub.f32 0.0, %v543_v40  ;;  %v408_v45 = vadd.f32 %v407_v30, %v347_v41 }
  0xda   : > { %v413_v42 = vpop.f32.mrf.mxu3  ;;  %v717_v47 = vpop.eup %716  ;;  %v560_v48 = vmul.f32 1.442695, %v551_v44  ;;  %v470_v49 = vadd.f32 %v469_v31, %v408_v45 }
  0xdb   : > { %574 = vst [vmem:[%s952_s30] sm:$0xff] %v717_v47 }
  0xdc   : > { %718 = vpow2.f32 %v560_v48  ;;  %v520_v51 = vadd.f32 %v519_v32, %v470_v49  ;;  %v527_v62 = vpop.f32.mrf.mxu1 }
  0xdd   : > { %v351_v52 = vpop.f32.mrf.mxu2 }
  0xde   : > { %v544_v53 = vmul.f32 %v520_v51, %v520_v51  ;;  %v352_v54 = vadd.f32 %v351_v52, %v297_v50 }
  0xe0   : > { %v552_v56 = vsub.f32 0.0, %v544_v53  ;;  %v414_v57 = vadd.f32 %v413_v42, %v352_v54  ;;  %v477_v58 = vpop.f32.mrf.mxu0 }
  0xe2   : > { %v419_v55 = vpop.f32.mrf.mxu3  ;;  %v719_v59 = vpop.eup %718  ;;  %v562_v60 = vmul.f32 1.442695, %v552_v56  ;;  %v474_v61 = vadd.f32 %v473_v43, %v414_v57 }
  0xe3   : > { %575 = vst [vmem:[%s952_s30 + $0x8] sm:$0xff] %v719_v59 }
  0xe4   : > { %720 = vpow2.f32 %v562_v60  ;;  %v524_v1 = vadd.f32 %v523_v46, %v474_v61  ;;  %v531_v2 = vpop.f32.mrf.mxu1 }
  0xe5   : > { %v356_v4 = vpop.f32.mrf.mxu2 }
  0xe6   : > { %v545_v5 = vmul.f32 %v524_v1, %v524_v1  ;;  %v357_v8 = vadd.f32 %v356_v4, %v301_v0 }
  0xe8   : > { %v553_v9 = vsub.f32 0.0, %v545_v5  ;;  %v420_v12 = vadd.f32 %v419_v55, %v357_v8  ;;  %v481_v18 = vpop.f32.mrf.mxu0 }
  0xea   : > { %v425_v13 = vpop.f32.mrf.mxu3  ;;  %v721_v15 = vpop.eup %720  ;;  %v564_v16 = vmul.f32 1.442695, %v553_v9  ;;  %v478_v17 = vadd.f32 %v477_v58, %v420_v12 }
  0xeb   : > { %576 = vst [vmem:[%s952_s30 + $0x10] sm:$0xff] %v721_v15 }
  0xec   : > { %722 = vpow2.f32 %v564_v16  ;;  %v528_v20 = vadd.f32 %v527_v62, %v478_v17  ;;  %v535_v33 = vpop.f32.mrf.mxu1 }
  0xed   : > { %v361_v63 = vpop.f32.mrf.mxu2 }
  0xee   : > { %v546_v21 = vmul.f32 %v528_v20, %v528_v20  ;;  %v362_v22 = vadd.f32 %v361_v63, %v305_v19 }
  0xf0   : > { %v554_v23 = vsub.f32 0.0, %v546_v21  ;;  %v426_v24 = vadd.f32 %v425_v13, %v362_v22  ;;  %v485_v6 = vpop.f32.mrf.mxu0 }
  0xf2   : > { %v723_v25 = vpop.eup %722  ;;  %v566_v26 = vmul.f32 1.442695, %v554_v23  ;;  %v482_v27 = vadd.f32 %v481_v18, %v426_v24  ;;  %v431_v28 = vpop.f32.mrf.mxu3 }
  0xf3   : > { %577 = vst [vmem:[%s952_s30 + $0x18] sm:$0xff] %v723_v25 }
  0xf4   : > { %724 = vpow2.f32 %v566_v26  ;;  %v532_v30 = vadd.f32 %v531_v2, %v482_v27  ;;  %v539_v46 = vpop.f32.mrf.mxu1 }
  0xf5   : > { %v366_v3 = vpop.f32.mrf.mxu2 }
  0xf6   : > { %v547_v31 = vmul.f32 %v532_v30, %v532_v30  ;;  %v367_v32 = vadd.f32 %v366_v3, %v309_v29 }
  0xf8   : > { %v555_v34 = vsub.f32 0.0, %v547_v31  ;;  %v432_v35 = vadd.f32 %v431_v28, %v367_v32  ;;  %v489_v43 = vpop.f32.mrf.mxu0 }
  0xfa   : > { %v725_v36 = vpop.eup %724  ;;  %v568_v37 = vmul.f32 1.442695, %v555_v34  ;;  %v486_v38 = vadd.f32 %v485_v6, %v432_v35  ;;  %v437_v10 = vpop.f32.mrf.mxu3 }
  0xfb   : > { %578 = vst [vmem:[%s952_s30 + $0x20] sm:$0xff] %v725_v36 }
  0xfc   : > { %726 = vpow2.f32 %v568_v37  ;;  %v536_v40 = vadd.f32 %v535_v33, %v486_v38 }
  0xfd   : > { %v371_v7 = vpop.f32.mrf.mxu2 }
  0xfe   : > { %v548_v41 = vmul.f32 %v536_v40, %v536_v40  ;;  %v372_v42 = vadd.f32 %v371_v7, %v313_v39 }
 0x100   : > { %v556_v44 = vsub.f32 0.0, %v548_v41  ;;  %v438_v45 = vadd.f32 %v437_v10, %v372_v42 }
 0x102   : > { %v727_v47 = vpop.eup %726  ;;  %v570_v48 = vmul.f32 1.442695, %v556_v44  ;;  %v490_v49 = vadd.f32 %v489_v43, %v438_v45 }
 0x103   : > { %579 = vst [vmem:[%s952_s30 + $0x28] sm:$0xff] %v727_v47 }
 0x104   : > { %728 = vpow2.f32 %v570_v48  ;;  %v540_v11 = vadd.f32 %v539_v46, %v490_v49 }
 0x106   : > { %v549_v14 = vmul.f32 %v540_v11, %v540_v11 }
 0x108   : > { %v557_v50 = vsub.f32 0.0, %v549_v14 }
 0x10a   : > { %v729_v51 = vpop.eup %728  ;;  %v572_v52 = vmul.f32 1.442695, %v557_v50 }
 0x10b   : > { %580 = vst [vmem:[%s952_s30 + $0x30] sm:$0xff] %v729_v51 }
 0x10c   : > { %730 = vpow2.f32 %v572_v52 }
 0x112   : > { %v731_v53 = vpop.eup %730 }
 0x113   : > { %581 = vst [vmem:[%s952_s30 + $0x38] sm:$0xff] %v731_v53 }
 0x114   : > { %759 = shalt.err (!%p756_p3)
}
 0x115   : > { %s796_s25 = smov 128   ;;  %s797_s26 = smov 8  }
 0x116   : > { %675 = dma.vmem_to_hbm [thread:$0]  (%p851_p5), %s596_s7, 1024, %s598_s8, %s583_s14, %s796_s25, %s796_s25, %s797_s26  }
 0x117 PF: > { %p681_p4 = scmp.ge.s32.totalorder %s794_s12, 2  ;;  %s612_s27 = sand.u32 1, %s782_s9  }
 0x118   : > { %s613_s28 = scalar_lea.sflag [#allocation3], %s612_s27 }
 0x119   : > { %p678_p7 = pnand %p681_p4, %p855_p6 }
 0x11b   : > { %p679_p8 = pneg %p678_p7 }
 0x11d   : > { %777 = dma.done.wait (%p679_p8), %s613_s28, 1024  }
 0x11e   : > { %779 = vsyncadd (%p679_p8), %s613_s28, 4294966272  ;;  %p12_p9 = scmp.ge.s32.totalorder %s838_s15, 6   ;;  %s1009_s9 = smov %s786_s10 }
 0x11f   : > { %s1010_s10 = smov %s790_s11  ;;  %s1011_s11 = smov %s849_s18 }
 0x120   : > { %s1012_s12 = smov %s838_s15  ;;  %14 = sbr.rel (!%p12_p9) target bundleno = 3 (0x3), region = 63 }
 0x125   :  { %619 = vsyncpa [#allocation3], 1 }
 0x126   :  { %621 = vsyncpa [#allocation3 + $0x1], 1 }

</bundles_post_ra>
